<compile_context>
chip_gen: v6e
topology: v6e:2x2x1
jax: 0.10.0
libtpu: 0.0.40
codegen_flags: <defaults>
</compile_context>

<pallas_src>
import functools

import jax
import jax.numpy as jnp
from jax import lax
from jax.experimental import pallas as pl
from jax.experimental.pallas import tpu as pltpu

_MIB = 1024 * 1024


def _physical_vmem_bytes():
    """Per-core VMEM capacity; conservative 64 MiB (v7x) if the query fails."""
    try:
        return int(pltpu.get_tpu_info().vmem_capacity_bytes)
    except Exception:
        return 64 * _MIB


def _excite(m, w1t, w2, use_mxu):
    """SE excitation.  m: (tb, C) f32 mean; w1t = W1.T (C, C_red); w2 = W2 (C, C_red)."""
    if use_mxu:
        # Batched MXU path for large C (C >= 128, tb >= 8): two small matmuls.
        h = jnp.dot(m, w1t.astype(jnp.float32), preferred_element_type=jnp.float32)
        h = jnp.maximum(h, 0.0)                                          # (tb, C_red)
        s = lax.dot_general(h, w2.astype(jnp.float32),
                            dimension_numbers=(((1,), (1,)), ((), ())),  # h @ W2.T
                            preferred_element_type=jnp.float32)          # (tb, C)
    else:
        # VPU/XLU path: at tiny C/C_red the N=1-ish matvecs are not worth MXU
        # push/pop latency on the serial chain.
        h = jnp.sum(w1t.astype(jnp.float32)[None] * m[:, :, None], axis=1)  # (tb, C_red)
        h = jnp.maximum(h, 0.0)
        s = jnp.sum(w2.astype(jnp.float32)[None] * h[:, None, :], axis=2)   # (tb, C)
    return jax.nn.sigmoid(s)


# ----------------------------- Fused (single-pass) path -----------------------------


def _se_fused_kernel(x_ref, w1t_ref, w2_ref, o_ref, *, inv_hw, use_mxu, mul_dtype):
    # x_ref: (tb, C, HW);  w1t_ref: (C, C_red) = W1.T;  w2_ref: (C, C_red) = W2
    # Squeeze (f32 accumulation).
    m = jnp.sum(x_ref[...].astype(jnp.float32), axis=-1) * inv_hw        # (tb, C)
    # Excitation -> gate in f32, cast once to the multiply dtype.
    s = _excite(m, w1t_ref[...], w2_ref[...], use_mxu).astype(mul_dtype)  # (tb, C)
    # Scale: re-read x from VMEM (cheap vld) instead of keeping the slab live
    # across the excitation chain; gate broadcasts over the lane (HW) axis.
    o_ref[...] = (x_ref[...].astype(mul_dtype) * s[:, :, None]).astype(o_ref.dtype)


# ----------------------------- Split (gate + scale) path -----------------------------


def _se_squeeze_kernel(x_ref, w1t_ref, w2_ref, gate_ref, acc_ref, *,
                       inv_hw, hw, t_hw, use_mxu):
    # x_ref: (tb, C, t_hw); gate_ref: (tb, C) f32; acc_ref: (tb, C) f32 scratch.
    j = pl.program_id(1)

    @pl.when(j == 0)
    def _():
        acc_ref[...] = jnp.zeros_like(acc_ref)

    xs = x_ref[...].astype(jnp.float32)
    if hw % t_hw != 0:
        # Partial last HW tile: zero the out-of-range lanes before summing.
        lane = lax.broadcasted_iota(jnp.int32, xs.shape, 2)
        xs = jnp.where(j * t_hw + lane < hw, xs, 0.0)
    acc_ref[...] += jnp.sum(xs, axis=-1)

    @pl.when(j == pl.num_programs(1) - 1)
    def _():
        m = acc_ref[...] * inv_hw
        gate_ref[...] = _excite(m, w1t_ref[...], w2_ref[...], use_mxu)


def _se_scale_kernel(x_ref, gate_ref, o_ref, *, mul_dtype):
    s = gate_ref[...].astype(mul_dtype)                                   # (tb, C)
    o_ref[...] = (x_ref[...].astype(mul_dtype) * s[:, :, None]).astype(o_ref.dtype)


# ----------------------------------- Wrapper -----------------------------------


def se_layer(x, w1, w2, *, target_block_bytes=None, vmem_limit_bytes=None,
             force_split=False):
    """SELayer forward.  x: (B, C, H, W); w1: (C//r, C); w2: (C, C//r)."""
    B, C, H, W = x.shape
    C_red = w1.shape[0]
    HW = H * W
    x3 = x.reshape(B, C, HW)                      # free (metadata only)

    # Per-generation sizing: 64 MiB parts (v7x) get small blocks / tight cap;
    # 128 MiB parts (v5e/v6e) get larger blocks for fewer grid steps.
    small_vmem = _physical_vmem_bytes() <= 64 * _MIB
    if vmem_limit_bytes is None:
        vmem_limit_bytes = 48 * _MIB if small_vmem else 96 * _MIB
    if target_block_bytes is None:
        target_block_bytes = 4 * _MIB if small_vmem else 12 * _MIB

    itemsize = jnp.dtype(x.dtype).itemsize
    slab_bytes = C * HW * itemsize                # one batch element of x
    # 16-bit inputs: compute the gate in f32 but multiply/store in native dtype.
    # TODO(synk): keep the f32 multiply on v5e (no bf16 VALU) if targeting v5e.
    mul_dtype = x.dtype if itemsize == 2 else jnp.float32

    w1t = jnp.transpose(w1)                       # (C, C_red) = W1.T
    # w2 is already (C, C_red) in the PyTorch layout.

    # Double-buffered in + out blocks must fit the VMEM budget even at tb=1.
    fused_ok = (not force_split) and (4 * slab_bytes <= vmem_limit_bytes)

    if fused_ok:
        # ---- Fused single-pass kernel over batch tiles ----
        tb = max(1, min(B, target_block_bytes // max(1, slab_bytes)))
        if B >= 2:
            tb = min(tb, pl.cdiv(B, 2))           # grid >= 2: both v7x TCs + overlap
        while tb > 1 and 4 * tb * slab_bytes > vmem_limit_bytes:
            tb -= 1
        grid_b = pl.cdiv(B, tb)                   # partial last batch tile is masked
        use_mxu = (C >= 128) and (tb >= 8)

        kernel = functools.partial(_se_fused_kernel, inv_hw=1.0 / HW,
                                   use_mxu=use_mxu, mul_dtype=mul_dtype)
        out = pl.pallas_call(
            kernel,
            out_shape=jax.ShapeDtypeStruct((B, C, HW), x.dtype),
            grid_spec=pltpu.PrefetchScalarGridSpec(
                num_scalar_prefetch=0,
                grid=(grid_b,),
                in_specs=[
                    pl.BlockSpec((tb, C, HW), lambda b: (b, 0, 0)),   # x batch tile
                    pl.BlockSpec((C, C_red), lambda b: (0, 0)),       # W1.T (resident)
                    pl.BlockSpec((C, C_red), lambda b: (0, 0)),       # W2   (resident)
                ],
                out_specs=pl.BlockSpec((tb, C, HW), lambda b: (b, 0, 0)),
            ),
            compiler_params=pltpu.CompilerParams(
                dimension_semantics=("parallel",),
                vmem_limit_bytes=vmem_limit_bytes,
            ),
        )(x3, w1t, w2)
        return out.reshape(B, C, H, W)

    # ---- Split path: HW-tiled squeeze+excitation (gate) + HW-tiled scale ----
    lanes_per_block = max(1, target_block_bytes // max(1, C * itemsize))
    if lanes_per_block >= HW:
        t_hw = HW                                 # full last dim: always legal
    else:
        t_hw = max(128, (lanes_per_block // 128) * 128)  # lane-dense tiles
    n_hw = pl.cdiv(HW, t_hw)

    block_bytes = C * t_hw * itemsize
    tb = max(1, min(B, target_block_bytes // max(1, block_bytes)))
    if B >= 2:
        tb = min(tb, pl.cdiv(B, 2))
    grid_b = pl.cdiv(B, tb)
    use_mxu = (C >= 128) and (tb >= 8)

    # (a) gate = sigmoid(W2 @ relu(W1 @ mean(x)))  -- one streaming read of x.
    squeeze = functools.partial(_se_squeeze_kernel, inv_hw=1.0 / HW, hw=HW,
                                t_hw=t_hw, use_mxu=use_mxu)
    gate = pl.pallas_call(
        squeeze,
        out_shape=jax.ShapeDtypeStruct((B, C), jnp.float32),
        grid_spec=pltpu.PrefetchScalarGridSpec(
            num_scalar_prefetch=0,
            grid=(grid_b, n_hw),
            in_specs=[
                pl.BlockSpec((tb, C, t_hw), lambda b, j: (b, 0, j)),
                pl.BlockSpec((C, C_red), lambda b, j: (0, 0)),
                pl.BlockSpec((C, C_red), lambda b, j: (0, 0)),
            ],
            out_specs=pl.BlockSpec((tb, C), lambda b, j: (b, 0)),
            scratch_shapes=[pltpu.VMEM((tb, C), jnp.float32)],
        ),
        compiler_params=pltpu.CompilerParams(
            dimension_semantics=("parallel", "arbitrary"),
            vmem_limit_bytes=vmem_limit_bytes,
        ),
    )(x3, w1t, w2)

    # (b) out = x * gate  -- one read + one write of x, pointwise, HW-tiled.
    scale = functools.partial(_se_scale_kernel, mul_dtype=mul_dtype)
    out = pl.pallas_call(
        scale,
        out_shape=jax.ShapeDtypeStruct((B, C, HW), x.dtype),
        grid_spec=pltpu.PrefetchScalarGridSpec(
            num_scalar_prefetch=0,
            grid=(grid_b, n_hw),
            in_specs=[
                pl.BlockSpec((tb, C, t_hw), lambda b, j: (b, 0, j)),
                pl.BlockSpec((tb, C), lambda b, j: (b, 0)),
            ],
            out_specs=pl.BlockSpec((tb, C, t_hw), lambda b, j: (b, 0, j)),
        ),
        compiler_params=pltpu.CompilerParams(
            dimension_semantics=("parallel", "parallel"),
            vmem_limit_bytes=vmem_limit_bytes,
        ),
    )(x3, gate)
    return out.reshape(B, C, H, W)


def se_reference(x, w1, w2):
    y = jnp.mean(x.astype(jnp.float32), axis=(2, 3))      # (B, C)
    y = jnp.maximum(y @ w1.T.astype(jnp.float32), 0.0)    # (B, C//r)
    y = jax.nn.sigmoid(y @ w2.T.astype(jnp.float32))      # (B, C)
    return (x.astype(jnp.float32) * y[:, :, None, None]).astype(x.dtype)


if __name__ == "__main__":
    # SELayer(channel=32, reduction=16) -> hidden = 2
    B, C, H, W = 2, 32, 16, 16
    reduction = 16
    C_red = int(C / reduction)

    key = jax.random.PRNGKey(0)
    kx, k1, k2 = jax.random.split(key, 3)
    x = jax.random.normal(kx, (B, C, H, W), dtype=jnp.float32)
    # Deterministic synthetic weights (PyTorch Linear layout: (out, in)).
    w1 = jax.random.normal(k1, (C_red, C), dtype=jnp.float32) * 0.1
    w2 = jax.random.normal(k2, (C, C_red), dtype=jnp.float32) * 0.1

    # Fused single-pass path.
    out = se_layer(x, w1, w2)
    jax.block_until_ready(out)
    ref = se_reference(x, w1, w2)
    assert out.shape == (B, C, H, W)
    assert jnp.allclose(out, ref, atol=1e-5, rtol=1e-5)

    # Split (gate + scale) fallback path, forced at a small shape whose HW is
    # not a multiple of 128 and whose B is odd -> exercises masked partial HW
    # tile, partial batch tile, and the accumulator init/finalize.
    B2, H2, W2 = 3, 12, 12
    x2 = jax.random.normal(kx, (B2, C, H2, W2), dtype=jnp.float32)
    out2 = se_layer(x2, w1, w2, force_split=True, target_block_bytes=16 * 1024)
    jax.block_until_ready(out2)
    ref2 = se_reference(x2, w1, w2)
    assert out2.shape == (B2, C, H2, W2)
    assert jnp.allclose(out2, ref2, atol=1e-5, rtol=1e-5)

    print("KERNEL_OK")
</pallas_src>

<mosaic_0001>
module attributes {stable_mosaic.version = 11 : i64} {
  func.func @_se_fused_kernel(%arg0: i32, %arg1: memref<1x32x256xf32, #tpu.memory_space<vmem>>, %arg2: memref<32x2xf32, #tpu.memory_space<vmem>>, %arg3: memref<32x2xf32, #tpu.memory_space<vmem>>, %arg4: memref<1x32x256xf32, #tpu.memory_space<vmem>>) attributes {dimension_semantics = [#tpu.dimension_semantics<parallel>], iteration_bounds = array<i64: 2>, scalar_prefetch = 0 : i64, scratch_operands = 0 : i64, tpu.core_type = #tpu.core_type<tc>, window_params = [{transform_indices = @transform_0, window_bounds = array<i64: 1, 32, 256>}, {pipeline_mode = #tpu.pipeline_mode<synchronous>, transform_indices = @transform_1, window_bounds = array<i64: 32, 2>}, {pipeline_mode = #tpu.pipeline_mode<synchronous>, transform_indices = @transform_2, window_bounds = array<i64: 32, 2>}, {transform_indices = @transform_3, window_bounds = array<i64: 1, 32, 256>}]} {
    %c0 = arith.constant 0 : index
    %c0_0 = arith.constant 0 : index
    %c0_1 = arith.constant 0 : index
    %0 = vector.load %arg1[%c0, %c0_0, %c0_1] : memref<1x32x256xf32, #tpu.memory_space<vmem>>, vector<1x32x256xf32>
    %cst = arith.constant dense<0.000000e+00> : vector<1x32xf32>
    %1 = vector.multi_reduction <add>, %0, %cst [2] : vector<1x32x256xf32> to vector<1x32xf32>
    %cst_2 = arith.constant 3.906250e-03 : f32
    %2 = vector.broadcast %cst_2 : f32 to vector<1x32xf32>
    %3 = arith.mulf %1, %2 : vector<1x32xf32>
    %c0_3 = arith.constant 0 : index
    %c0_4 = arith.constant 0 : index
    %4 = vector.load %arg2[%c0_3, %c0_4] : memref<32x2xf32, #tpu.memory_space<vmem>>, vector<32x2xf32>
    %c0_5 = arith.constant 0 : index
    %c0_6 = arith.constant 0 : index
    %5 = vector.load %arg3[%c0_5, %c0_6] : memref<32x2xf32, #tpu.memory_space<vmem>>, vector<32x2xf32>
    %6 = vector.shape_cast %4 : vector<32x2xf32> to vector<1x32x2xf32>
    %7 = vector.shape_cast %3 : vector<1x32xf32> to vector<1x32x1xf32>
    %8 = vector.broadcast %7 : vector<1x32x1xf32> to vector<1x32x2xf32>
    %9 = arith.mulf %6, %8 : vector<1x32x2xf32>
    %cst_7 = arith.constant dense<0.000000e+00> : vector<1x2xf32>
    %10 = vector.multi_reduction <add>, %9, %cst_7 [1] : vector<1x32x2xf32> to vector<1x2xf32>
    %cst_8 = arith.constant 0.000000e+00 : f32
    %11 = vector.broadcast %cst_8 : f32 to vector<1x2xf32>
    %12 = arith.maximumf %10, %11 : vector<1x2xf32>
    %13 = vector.shape_cast %5 : vector<32x2xf32> to vector<1x32x2xf32>
    %14 = vector.shape_cast %12 : vector<1x2xf32> to vector<1x1x2xf32>
    %15 = vector.broadcast %14 : vector<1x1x2xf32> to vector<1x32x2xf32>
    %16 = arith.mulf %13, %15 : vector<1x32x2xf32>
    %cst_9 = arith.constant dense<0.000000e+00> : vector<1x32xf32>
    %17 = vector.multi_reduction <add>, %16, %cst_9 [2] : vector<1x32x2xf32> to vector<1x32xf32>
    %18 = arith.negf %17 : vector<1x32xf32>
    %19 = math.exp %18 : vector<1x32xf32>
    %cst_10 = arith.constant 1.000000e+00 : f32
    %20 = vector.broadcast %cst_10 : f32 to vector<1x32xf32>
    %21 = arith.addf %20, %19 : vector<1x32xf32>
    %22 = arith.divf %20, %21 : vector<1x32xf32>
    %c0_11 = arith.constant 0 : index
    %c0_12 = arith.constant 0 : index
    %c0_13 = arith.constant 0 : index
    %23 = vector.load %arg1[%c0_11, %c0_12, %c0_13] : memref<1x32x256xf32, #tpu.memory_space<vmem>>, vector<1x32x256xf32>
    %24 = vector.shape_cast %22 : vector<1x32xf32> to vector<1x32x1xf32>
    %25 = vector.broadcast %24 : vector<1x32x1xf32> to vector<1x32x256xf32>
    %26 = arith.mulf %23, %25 : vector<1x32x256xf32>
    %c0_14 = arith.constant 0 : index
    %c0_15 = arith.constant 0 : index
    %c0_16 = arith.constant 0 : index
    %27 = vector.load %arg4[%c0_14, %c0_15, %c0_16] : memref<1x32x256xf32, #tpu.memory_space<vmem>>, vector<1x32x256xf32>
    tpu.vector_store %arg4[%c0_14, %c0_15, %c0_16], %26 {strides = array<i32>} : memref<1x32x256xf32, #tpu.memory_space<vmem>>, vector<1x32x256xf32>,
    return
  }
  func.func @transform_0(%arg0: i32) -> (i32, i32, i32) {
    %c0_i32 = arith.constant 0 : i32
    %c0_i32_0 = arith.constant 0 : i32
    %c0_i32_1 = arith.constant 0 : i32
    return %arg0, %c0_i32, %c0_i32_0 : i32, i32, i32
  }
  func.func @transform_1(%arg0: i32) -> (i32, i32) {
    %c0_i32 = arith.constant 0 : i32
    %c0_i32_0 = arith.constant 0 : i32
    %c0_i32_1 = arith.constant 0 : i32
    return %c0_i32, %c0_i32_0 : i32, i32
  }
  func.func @transform_2(%arg0: i32) -> (i32, i32) {
    %c0_i32 = arith.constant 0 : i32
    %c0_i32_0 = arith.constant 0 : i32
    %c0_i32_1 = arith.constant 0 : i32
    return %c0_i32, %c0_i32_0 : i32, i32
  }
  func.func @transform_3(%arg0: i32) -> (i32, i32, i32) {
    %c0_i32 = arith.constant 0 : i32
    %c0_i32_0 = arith.constant 0 : i32
    %c0_i32_1 = arith.constant 0 : i32
    return %arg0, %c0_i32, %c0_i32_0 : i32, i32, i32
  }
}

</mosaic_0001>

<bundles_post_ra>
// kernel: tpu_custom_call.1
= control target key start
LH: loop header
LB: loop body
LE: loop exit
PB: predicated region body
PF: predicated region fallthrough
CT: control target
= control target key end

     0   :  { %8 = vsyncpa [#allocation3], 0  ;;  %s811_s0 = inlined_call_operand.hbm [shape: f32[2,32,256], index: 0, kind: input, shape index: {}]   ;;  %s812_s1 = inlined_call_operand.vmem [shape: f32[32,2], index: 1, kind: input, shape index: {}]   ;;  %s813_s2 = inlined_call_operand.vmem [shape: f32[32,2], index: 2, kind: input, shape index: {}]   ;;  %s814_s3 = inlined_call_operand.hbm [shape: f32[2,32,256], index: 3, kind: output, shape index: {}]  }
   0x1   :  { %10 = vsyncpa [#allocation3 + $0x1], 0 }
   0x2   :  { %11 = vsyncpa [#allocation4], 0 }
   0x3   :  { %13 = vsyncpa [#allocation4 + $0x1], 0  ;;  %s589_s12 = smov 0   ;;  %s591_s13 = smov 0  }
   0x4   :  { %s593_s14 = smov 0   ;;  %s595_s15 = smov 0  }
   0x5 LB: > { %s610_s16 = sadd.s32 4294967295, %s561_s15   ;;  %s383_s17 = sadd.s32 4294967294, %s561_s15   ;;  %s561_s15 = sphi %s595_s15, %s829_s15   ;;  %s557_s14 = sphi %s593_s14, %s828_s14   ;;  %s553_s13 = sphi %s591_s13, %s827_s13   ;;  %s549_s12 = sphi %s589_s12, %s826_s12  }
   0x6   : > { %s614_s18 = sadd.s32 1, %s561_s15   ;;  %s26_s19 = sadd.s32 1, %s557_s14 }
   0x7   : > { %s23_s20 = ssub.s32 %s561_s15, %s614_s18  ;;  %p33_p0 = scmp.ne.s32.totalorder %s557_s14, %s553_s13 }
   0x8   : > { %p24_p1 = scmp.eq.s32.totalorder %s23_s20, 0  ;;  %p34_p2 = scmp.eq.s32.totalorder %s561_s15, 0 }
   0x9   : > { %p39_p3 = scmp.ne.s32.totalorder %s553_s13, %s549_s12  ;;  %p40_p4 = scmp.eq.s32.totalorder %s610_s16, 0 }
   0xa   : > { %s626_s21 = scalar_select %p24_p1, %s557_s14, %s26_s19  }
   0xb   : > { %p628_p5 = por %p34_p2, %p33_p0  ;;  %p632_p6 = por %p40_p4, %p39_p3 }
   0xc   : > { %p105_p7 = scmp.eq.s32.totalorder %s610_s16, 1  ;;  %p111_p8 = scmp.eq.s32.totalorder %s383_s17, 1 }
   0xd   : > { %s818_s23 = scalar_select %p632_p6, 1, 0 }
   0xe   : > { %p415_p10 = scmp.lt.s32.totalorder %s561_s15, 2  ;;  %p639_p11 = por %p105_p7, %p33_p0 }
   0xf   : > { %p643_p12 = por %p111_p8, %p39_p3  ;;  %s137_s26 = sand.u32 1, %s557_s14  }
  0x10   : > { %s819_s24 = scalar_select %p639_p11, 1, 0 }
  0x11   : > { %s820_s25 = scalar_select %p643_p12, 1, 0 }
  0x12   : > { %s401_s27 = sshll.u32 %s561_s15, 10  ;;  %s386_s28 = sshll.u32 %s137_s26, 6 }
  0x13   : > { %s652_s4 = scalar_lea.hbm %s811_s0, %s401_s27  ;;  %s141_s5 = scalar_lea.vmem [#allocation2], %s386_s28 }
  0x14   : > { %s148_s6 = sshll.u32 %s141_s5, 4  ;;  %p656_p13 = pnand %p415_p10, %p628_p5  ;;  %s660_s6 = int_to_ptr.vmem [resolvable:$true] %s148_s6 }
  0x15   : > { %s662_s8 = scalar_lea.sflag [#allocation3], %s137_s26  ;;  %s469_s9 = scalar_lea.hbm %s652_s4, 1024 }
  0x16   : > { %p470_p0 = scmp.ne.s32.totalorder %s652_s4, %s469_s9  ;;  %p471_p1 = pneg %p656_p13 }
  0x17   : > { %s474_s17 = scalar_lea.hbm %s811_s0, 2048  ;;  %p475_p4 = scmp.lt.s32.totalorder %s652_s4, %s811_s0 }
  0x18   : > { %p472_p2 = pnand %p471_p1, %p470_p0  ;;  %p476_p5 = scmp.lt.s32.totalorder %s474_s17, %s469_s9 }
  0x1a   : > { %p473_p3 = pneg %p472_p2  ;;  %p477_p7 = por %p476_p5, %p475_p4 }
  0x1c   : > { %p478_p8 = pnand %p477_p7, %p473_p3 }
  0x1e   : > { %481 = shalt.err (!%p478_p8)
}
  0x1f   : > { %s482_s22 = scalar_lea.vmem %s660_s6, 1024  ;;  %s563_s26 = smov [#allocation2]  }
  0x20   : > { %p483_p10 = scmp.ne.s32.totalorder %s660_s6, %s482_s22  ;;  %s487_s27 = sshll.u32 %s563_s26, 4  ;;  %s488_s27 = int_to_ptr.vmem [resolvable:$false] %s487_s27 }
  0x21   : > { %s489_s28 = scalar_lea.vmem %s488_s27, 2048  ;;  %p490_p2 = scmp.lt.s32.totalorder %s660_s6, %s488_s27 }
  0x22   : > { %p485_p9 = pnand %p483_p10, %p471_p1  ;;  %p491_p12 = scmp.lt.s32.totalorder %s489_s28, %s482_s22 }
  0x24   : > { %p486_p0 = pneg %p485_p9  ;;  %p492_p11 = por %p491_p12, %p490_p2 }
  0x26   : > { %p493_p6 = pnand %p492_p11, %p486_p0 }
  0x28   : > { %496 = shalt.err (!%p493_p6)
}
  0x29   : > { %s564_s29 = smov 256   ;;  %s565_s30 = smov 16  }
  0x2a   : > { %410 = dma.hbm_to_vmem [thread:$0]  (!%p656_p13), %s652_s4, 1024, %s660_s6, %s662_s8, %s564_s29, %s564_s29, %s565_s30  }
  0x2b   : > { %p389_p9 = scmp.ge.s32.totalorder %s561_s15, 1  ;;  %p156_p1 = scmp.lt.s32.totalorder %s561_s15, 3 }
  0x2d   : > { %p157_p3 = pnand %p389_p9, %p156_p1 }
  0x2e   : > { %s686_s5 = sand.u32 (!%p157_p3), 1, %s553_s13   ;;  %p822_p6 = scmp.ne.s32.totalorder (!%p157_p3), %s818_s23, 0 }
  0x2f   : > { %160 = sbr.rel (%p157_p3) target bundleno = 417 (0x1a1), region = 32  ;;  %s390_s9 = sshll.u32 (!%p157_p3), %s686_s5, 6 }
  0x30   : > { %s163_s10 = scalar_lea.sflag (!%p157_p3), [#allocation3], %s686_s5  ;;  %s166_s11 = scalar_lea.vmem (!%p157_p3), [#allocation2], %s390_s9 }
  0x34   : > { %540 = dma.done.wait (%p822_p6), %s163_s10, 1024  }
  0x35   : > { %542 = vsyncadd (%p822_p6), %s163_s10, 4294966272  ;;  %v696_v0 = vld [vmem:[%s166_s11] sm:$0xff]  ;;  %v698_v1 = vld [vmem:[%s166_s11 + $0x8] sm:$0xff]  ;;  %vm225_vm0 = vcmask 15360   ;;  %s402_s23 = sshll.u32 %s610_s16, 10  ;;  %s188_s4 = scalar_lea.vmem [#allocation5], %s390_s9 }
  0x36   : > { %v700_v2 = vld [vmem:[%s166_s11 + $0x20] sm:$0xff]  ;;  %v197_v3 = vadd.f32 %v698_v1, %v696_v0  ;;  %v704_v4 = vld [vmem:[%s166_s11 + $0x28] sm:$0xff]  ;;  %v706_v5 = vld [vmem:[%s166_s11 + $0x10] sm:$0xff]  ;;  %s310_s6 = sshll.u32 %s188_s4, 4  ;;  %s764_s17 = scalar_lea.hbm %s814_s3, %s402_s23  ;;  %s766_s6 = int_to_ptr.vmem [resolvable:$true] %s310_s6 }
  0x37   : > { %v708_v6 = vld [vmem:[%s166_s11 + $0x18] sm:$0xff]  ;;  %v203_v7 = vadd.f32 %v704_v4, %v700_v2  ;;  %v712_v8 = vld [vmem:[%s166_s11 + $0x30] sm:$0xff]  ;;  %v213_v15 = vld [vmem:[%s812_s1] sm:$0xff]  ;;  %s297_s16 = scalar_lea.sflag [#allocation4], %s686_s5  ;;  %s497_s9 = scalar_lea.vmem %s766_s6, 1024 }
  0x38   : > { %v714_v9 = vld [vmem:[%s166_s11 + $0x38] sm:$0xff]  ;;  %198 = vadd.xlane.f32.xlu0 %v197_v3  ;;  %v200_v10 = vadd.f32 %v708_v6, %v706_v5  ;;  %v215_v17 = vld [vmem:[%s812_s1 + $0x10] sm:$0xff]  ;;  %v214_v18 = vld [vmem:[%s812_s1 + $0x8] sm:$0xff]  ;;  %p498_p11 = scmp.ne.s32.totalorder %s766_s6, %s497_s9  ;;  %p823_p12 = scmp.ne.s32.totalorder %s819_s24, 0 }
  0x39   : > { %204 = vadd.xlane.f32.xlu1 %v203_v7  ;;  %v206_v11 = vadd.f32 %v714_v9, %v712_v8  ;;  %v216_v22 = vld [vmem:[%s812_s1 + $0x18] sm:$0xff]  ;;  %v218_v41 = vld [vmem:[%s813_s2 + $0x8] sm:$0xff]  ;;  %v217_v42 = vld [vmem:[%s813_s2] sm:$0xff]  ;;  %s566_s19 = smov [#allocation5]  }
  0x3a   : > { %v220_v44 = vld [vmem:[%s813_s2 + $0x18] sm:$0xff]  ;;  %v219_v45 = vld [vmem:[%s813_s2 + $0x10] sm:$0xff]  ;;  %p499_p13 = pnand %p498_p11, %p823_p12  ;;  %s501_s20 = sshll.u32 %s566_s19, 4  ;;  %s502_s20 = int_to_ptr.vmem [resolvable:$false] %s501_s20 }
  0x3b   : > { %s503_s22 = scalar_lea.vmem %s502_s20, 2048  ;;  %p504_p5 = scmp.lt.s32.totalorder %s766_s6, %s502_s20 }
  0x3c   : > { %201 = vadd.xlane.f32.xlu0 %v200_v10  ;;  %p500_p4 = pneg %p499_p13  ;;  %p505_p7 = scmp.lt.s32.totalorder %s503_s22, %s497_s9 }
  0x3d   : > { %207 = vadd.xlane.f32.xlu1 %v206_v11 }
  0x3e   : > { %p506_p8 = por %p505_p7, %p504_p5 }
  0x40   : > { %p507_p10 = pnand %p506_p8, %p500_p4 }
  0xc1   : > { %v199_v12 = vpop.xlane.xlu0 %198 }
  0xc2   : > { %v209_v13 = vmul.f32 0.00390625, %v199_v12  ;;  %v205_v14 = vpop.xlane.xlu1 %204 }
  0xc3   : > { %v211_v16 = vmul.f32 0.00390625, %v205_v14 }
  0xc4   : > { %v221_v20 = vmul.f32 %v213_v15, %v209_v13 }
  0xc5   : > { %v202_v19 = vpop.xlane.xlu0 %201  ;;  %v223_v25 = vmul.f32 %v215_v17, %v211_v16 }
  0xc6   : > { %v210_v21 = vmul.f32 0.00390625, %v202_v19  ;;  %v208_v23 = vpop.xlane.xlu1 %207  ;;  %v226_v28 = vsel %vm225_vm0, %v221_v20, 0.0 }
  0xc7   : > { %v212_v24 = vmul.f32 0.00390625, %v208_v23  ;;  %v229_v31 = vsel %vm225_vm0, %v223_v25, 0.0 }
  0xc8   : > { %v222_v26 = vmul.f32 %v214_v18, %v210_v21 }
  0xc9   : > { %v224_v27 = vmul.f32 %v216_v22, %v212_v24 }
  0xca   : > { %v227_v29 = vsel %vm225_vm0, %v222_v26, 0.0 }
  0xcb   : > { %v228_v30 = vadd.f32 %v227_v29, %v226_v28  ;;  %v231_v32 = vsel %vm225_vm0, %v224_v27, 0.0 }
  0xcd   : > { %v230_v33 = vadd.f32 %v229_v31, %v228_v30 }
  0xcf   : > { %v232_v34 = vadd.f32 %v231_v32, %v230_v33 }
  0xd1   : > { %v233_v35 = vrot.slane %v232_v34, 4 }
  0xd3   : > { %v234_v36 = vadd.f32 %v233_v35, %v232_v34 }
  0xd5   : > { %v235_v37 = vrot.slane %v234_v36, 2 }
  0xd7   : > { %v236_v38 = vadd.f32 %v235_v37, %v234_v36 }
  0xd9   : > { %v237_v39 = vrot.slane %v236_v38, 1 }
  0xdb   : > { %v238_v40 = vadd.f32 %v237_v39, %v236_v38 }
  0xdd   : > { %v239_v43 = vmax.f32 %v238_v40, 0.0 }
  0xdf   : > { %v241_v46 = vmul.f32 %v239_v43, %v218_v41  ;;  %v240_v47 = vmul.f32 %v239_v43, %v217_v42  ;;  %v243_v50 = vmul.f32 %v239_v43, %v220_v44  ;;  %v242_v51 = vmul.f32 %v239_v43, %v219_v45 }
  0xe1   : > { %v247_v48 = vsel %vm225_vm0, %v241_v46, 0.0  ;;  %v244_v49 = vsel %vm225_vm0, %v240_v47, 0.0  ;;  %v253_v52 = vsel %vm225_vm0, %v243_v50, 0.0  ;;  %v250_v53 = vsel %vm225_vm0, %v242_v51, 0.0 }
  0xe2   : > { %248 = vadd.xlane.f32.xlu1 %v247_v48  ;;  %245 = vadd.xlane.f32.xlu0 %v244_v49 }
  0xe6   : > { %254 = vadd.xlane.f32.xlu1 %v253_v52  ;;  %251 = vadd.xlane.f32.xlu0 %v250_v53 }
 0x16b   : > { %v249_v54 = vpop.xlane.xlu1 %248  ;;  %v246_v55 = vpop.xlane.xlu0 %245 }
 0x16c   : > { %v393_v56 = vmul.f32 -1.442695, %v249_v54  ;;  %v392_v57 = vmul.f32 -1.442695, %v246_v55 }
 0x16e   : > { %453 = vpow2.f32 %v393_v56 }
 0x16f   : > { %455 = vpow2.f32 %v392_v57  ;;  %v255_v58 = vpop.xlane.xlu1 %254  ;;  %v252_v59 = vpop.xlane.xlu0 %251 }
 0x170   : > { %v395_v60 = vmul.f32 -1.442695, %v255_v58  ;;  %v394_v61 = vmul.f32 -1.442695, %v252_v59 }
 0x172   : > { %457 = vpow2.f32 %v395_v60 }
 0x173   : > { %459 = vpow2.f32 %v394_v61 }
 0x17b   : > { %v454_v62 = vpop.eup %453 }
 0x17c   : > { %v456_v63 = vpop.eup %455  ;;  %v269_v3 = vadd.f32 1.0, %v454_v62 }
 0x17d   : > { %v268_v7 = vadd.f32 1.0, %v456_v63 }
 0x17e   : > { %461 = vrcp.f32 %v269_v3 }
 0x17f   : > { %v458_v10 = vpop.eup %457  ;;  %463 = vrcp.f32 %v268_v7 }
 0x180   : > { %v460_v11 = vpop.eup %459  ;;  %v271_v12 = vadd.f32 1.0, %v458_v10 }
 0x181   : > { %v270_v13 = vadd.f32 1.0, %v460_v11 }
 0x182   : > { %465 = vrcp.f32 %v271_v12 }
 0x183   : > { %467 = vrcp.f32 %v270_v13 }
 0x18b   : > { %v462_v14 = vpop.eup %461 }
 0x18c   : > { %v464_v15 = vpop.eup %463  ;;  %v282_v16 = vmul.f32 %v462_v14, %v706_v5  ;;  %v283_v17 = vmul.f32 %v462_v14, %v708_v6 }
 0x18d   : > { %v280_v18 = vmul.f32 %v464_v15, %v696_v0  ;;  %v281_v19 = vmul.f32 %v464_v15, %v698_v1 }
 0x18e   : > { %290 = vst [vmem:[%s188_s4 + $0x10] sm:$0xff] %v282_v16  ;;  %291 = vst [vmem:[%s188_s4 + $0x18] sm:$0xff] %v283_v17 }
 0x18f   : > { %v466_v20 = vpop.eup %465  ;;  %288 = vst [vmem:[%s188_s4] sm:$0xff] %v280_v18  ;;  %289 = vst [vmem:[%s188_s4 + $0x8] sm:$0xff] %v281_v19 }
 0x190   : > { %v468_v21 = vpop.eup %467  ;;  %v286_v5 = vmul.f32 %v466_v20, %v712_v8  ;;  %v287_v6 = vmul.f32 %v466_v20, %v714_v9 }
 0x191   : > { %v284_v0 = vmul.f32 %v468_v21, %v700_v2  ;;  %v285_v1 = vmul.f32 %v468_v21, %v704_v4 }
 0x192   : > { %294 = vst [vmem:[%s188_s4 + $0x30] sm:$0xff] %v286_v5  ;;  %295 = vst [vmem:[%s188_s4 + $0x38] sm:$0xff] %v287_v6 }
 0x193   : > { %292 = vst [vmem:[%s188_s4 + $0x20] sm:$0xff] %v284_v0  ;;  %293 = vst [vmem:[%s188_s4 + $0x28] sm:$0xff] %v285_v1 }
 0x194   : > { %510 = shalt.err (!%p507_p10)
}
 0x195   : > { %s511_s26 = scalar_lea.hbm %s764_s17, 1024  ;;  %s515_s29 = scalar_lea.hbm %s814_s3, 2048 }
 0x196   : > { %p512_p0 = scmp.ne.s32.totalorder %s764_s17, %s511_s26  ;;  %p516_p1 = scmp.lt.s32.totalorder %s764_s17, %s814_s3 }
 0x197   : > { %p517_p3 = scmp.lt.s32.totalorder %s515_s29, %s511_s26 }
 0x198   : > { %p513_p2 = pnand %p512_p0, %p823_p12 }
 0x199   : > { %p518_p6 = por %p517_p3, %p516_p1 }
 0x19a   : > { %p514_p9 = pneg %p513_p2 }
 0x19c   : > { %p519_p11 = pnand %p518_p6, %p514_p9 }
 0x19e   : > { %522 = shalt.err (!%p519_p11)
}
 0x19f   : > { %s567_s11 = smov 256   ;;  %s568_s23 = smov 16  }
 0x1a0   : > { %405 = dma.vmem_to_hbm [thread:$0]  (%p823_p12), %s766_s6, 1024, %s764_s17, %s297_s16, %s567_s11, %s567_s11, %s568_s23  }
 0x1a1 PF: > { %s325_s4 = sand.u32 1, %s549_s12   ;;  %p824_p13 = scmp.ne.s32.totalorder %s820_s25, 0 }
 0x1a2   : > { %p825_p4 = scmp.ge.s32.totalorder %s561_s15, 2  ;;  %s326_s7 = scalar_lea.sflag [#allocation4], %s325_s4 }
 0x1a4   : > { %p412_p5 = pnand %p825_p4, %p824_p13 }
 0x1a6   : > { %p413_p7 = pneg %p412_p5 }
 0x1a8   : > { %544 = dma.done.wait (%p413_p7), %s326_s7, 1024  }
 0x1a9   : > { %546 = vsyncadd (%p413_p7), %s326_s7, 4294966272  ;;  %p16_p8 = scmp.ge.s32.totalorder %s614_s18, 4   ;;  %s826_s12 = smov %s553_s13 }
 0x1aa   : > { %s827_s13 = smov %s557_s14  ;;  %s828_s14 = smov %s626_s21 }
 0x1ab   : > { %s829_s15 = smov %s614_s18  ;;  %18 = sbr.rel (!%p16_p8) target bundleno = 5 (0x5), region = 77 }
 0x1b0   :  { %331 = vsyncpa [#allocation3], 1 }
 0x1b1   :  { %333 = vsyncpa [#allocation3 + $0x1], 1 }
 0x1b2   :  { %334 = vsyncpa [#allocation4], 1 }
 0x1b3   :  { %336 = vsyncpa [#allocation4 + $0x1], 1 }

</bundles_post_ra>
